<compile_context>
chip_gen: v7x
topology: tpu7x:2x2x1
jax: 0.10.0
libtpu: 0.0.40
codegen_flags: <defaults>
</compile_context>

<pallas_src>
import functools

import jax
import jax.numpy as jnp
from jax import lax
from jax.experimental import pallas as pl
from jax.experimental.pallas import tpu as pltpu

NEG_SLOPE = 0.01      # torch.nn.LeakyReLU default
_EPS = 1e-30          # guards rsqrt against all-zero (padded) rows


# ----------------------------------------------------------------------------
# Pass 1: projection + LeakyReLU + per-factor L2 normalisation (lane-dense)
#   x (TN, F_in), W (F_in, F_out), b (1, F_out), sel (F_out, F_out)
#   -> hn (TN, F_out)
# ----------------------------------------------------------------------------
def _project_norm_kernel(x_ref, w_ref, b_ref, sel_ref, hn_ref):
    h = jnp.dot(x_ref[...], w_ref[...],
                preferred_element_type=jnp.float32) + b_ref[...]
    h = jnp.where(h >= 0.0, h, NEG_SLOPE * h)                  # LeakyReLU
    # Per-factor sum-of-squares via a block-diagonal ones matmul: everything
    # stays (TN, F_out) lane-dense and the tiny matmul rides the idle MXU.
    ssq = jnp.dot(h * h, sel_ref[...], preferred_element_type=jnp.float32)
    hn_ref[...] = (h * lax.rsqrt(jnp.maximum(ssq, _EPS))).astype(hn_ref.dtype)


# ----------------------------------------------------------------------------
# Pass 2: neighbourhood-routing iterations for one dst node tile (all factors)
#   hn_ref  (N_pad, F_out)  VMEM-resident normalised features (all nodes)
#   adj_ref (TN, N_pad)     int8 0/1 adjacency row tile (dst rows of this tile)
#   o_ref   (TN, F_out)     output block (written lane-dense, once)
#   adjf_ref (n_src, TN, TS) f32 scratch: adjacency converted once per tile
# ----------------------------------------------------------------------------
def _routing_kernel(hn_ref, adj_ref, o_ref, adjf_ref, *,
                    K, d, TN, TS, n_src, iterations, inv_tau, compute_dtype):
    f32 = jnp.float32
    exact = jnp.dtype(compute_dtype) == jnp.dtype(jnp.float32)

    # int8 -> f32 conversion happens ONCE per node tile, outside every loop.
    for t in range(n_src):
        adjf_ref[t] = adj_ref[:, t * TS:(t + 1) * TS].astype(f32)

    dst_off = pl.multiple_of(pl.program_id(0) * TN, TN)

    def route_factor(lo):
        # Residual / initial value: this dst tile's features for factor k,
        # sliced from the resident hn slab (no duplicate hn_dst input).
        hn_dst = hn_ref[pl.ds(dst_off, TN), lo:lo + d].astype(f32)     # (TN, d)

        def one_iter(_, z):
            zs = (z * inv_tau).astype(compute_dtype)                    # (TN, d)

            def one_src_tile(t, carry):
                den, agg = carry
                s0 = pl.multiple_of(t * TS, TS)
                hk = hn_ref[pl.ds(s0, TS), lo:lo + d].astype(compute_dtype)
                # s[i, j] = <z_i, h_j> / tau  (contract last dims, no transpose)
                s = lax.dot_general(zs, hk, (((1,), (1,)), ((), ())),
                                    preferred_element_type=f32)         # (TN, TS)
                # |s| <= 1/tau so exp cannot overflow: mask multiplicatively
                # AFTER the exp (no -inf fill, no row-max reduce).
                e = jnp.exp(s) * adjf_ref[t]
                den = den + jnp.sum(e, axis=-1, keepdims=True)           # (TN, 1)
                agg = agg + jnp.dot(e.astype(compute_dtype), hk,
                                    preferred_element_type=f32)          # (TN, d)
                return den, agg

            den, agg = lax.fori_loop(
                0, n_src, one_src_tile,
                (jnp.zeros((TN, 1), f32), jnp.zeros((TN, d), f32)),
                unroll=n_src <= 8)

            # Isolated (or padded) dst rows get a zero aggregation (the torch
            # reference would produce NaN there).
            den = jnp.where(den == 0.0, 1.0, den)
            inv_den = 1.0 / den if exact else pl.reciprocal(den, approx=True)
            z = agg * inv_den + hn_dst
            ssq = jnp.sum(z * z, axis=-1, keepdims=True)
            return z * lax.rsqrt(jnp.maximum(ssq, _EPS))

        return lax.fori_loop(0, iterations, one_iter, hn_dst, unroll=True)

    # Each factor fills its static lane strip of the VMEM output block; the
    # (TN, F_out) block is written back to HBM lane-dense, once per node tile.
    for k in range(K):
        lo = k * d
        o_ref[:, lo:lo + d] = route_factor(lo).astype(o_ref.dtype)


# ----------------------------------------------------------------------------
# Wrapper
# ----------------------------------------------------------------------------
def disengcn_forward(x, weight, bias, adj_i8, *, K, iterations, tau=1.0,
                     block_rows=128, src_block=512,
                     compute_dtype=jnp.bfloat16, storage_dtype=None):
    """DisenGCN forward.  adj_i8: dense 0/1 (dst, src) adjacency, int8.

    compute_dtype: dtype fed to the MXU matmuls (bf16 on v6e/v7x, f32 for
    exact parity / v5e).  storage_dtype: HBM dtype of h_normed (defaults to
    compute_dtype; bf16 halves the stream even when compute stays f32).
    All accumulation is f32.
    """
    if storage_dtype is None:
        storage_dtype = compute_dtype

    N, F_in = x.shape
    F_out = weight.shape[1]
    assert F_out % K == 0
    d = F_out // K

    # Pad N so every node tile is full and the tile count is even (v7x
    # megacore shards the "parallel" node-tile axis across its 2 TCs).
    TN = block_rows
    n_tiles = pl.cdiv(N, TN)
    if n_tiles > 1 and n_tiles % 2 == 1:
        n_tiles += 1
    N_pad = n_tiles * TN

    # Source (neighbour) tile size: bounds the (TN, TS) temporaries wrt N.
    if N_pad <= src_block:
        TS = N_pad
    elif N_pad % src_block == 0:
        TS = src_block
    else:
        TS = TN
    n_src = N_pad // TS
    assert N_pad % TS == 0

    if N_pad != N:
        x = jnp.pad(x, ((0, N_pad - N), (0, 0)))
        adj_i8 = jnp.pad(adj_i8, ((0, N_pad - N), (0, N_pad - N)))

    # Block-diagonal ones selector for the per-factor norm in pass 1.
    fid = jnp.arange(F_out) // d
    sel = (fid[:, None] == fid[None, :]).astype(jnp.float32)

    # ---- Pass 1: h_normed, lane-dense (N_pad, F_out) -------------------------
    hn = pl.pallas_call(
        _project_norm_kernel,
        out_shape=jax.ShapeDtypeStruct((N_pad, F_out), storage_dtype),
        grid=(n_tiles,),
        in_specs=[
            pl.BlockSpec((TN, F_in), lambda i: (i, 0)),
            pl.BlockSpec((F_in, F_out), lambda i: (0, 0)),
            pl.BlockSpec((1, F_out), lambda i: (0, 0)),
            pl.BlockSpec((F_out, F_out), lambda i: (0, 0)),
        ],
        out_specs=pl.BlockSpec((TN, F_out), lambda i: (i, 0)),
        compiler_params=pltpu.CompilerParams(
            dimension_semantics=("parallel",)),
    )(x, weight, bias.reshape(1, -1), sel)

    # ---- Pass 2: routing; hn stays VMEM-resident ------------------------------
    est_vmem = (2 * N_pad * F_out * jnp.dtype(storage_dtype).itemsize  # hn
                + 2 * TN * N_pad                                       # int8 adj (dbl buf)
                + TN * N_pad * 4                                       # f32 adj scratch
                + 2 * TN * F_out * 4                                   # output block
                + 4 * TN * TS * 4)                                     # s/e temporaries
    vmem_limit = int(min(64 * 2**20, max(8 * 2**20, 2 * est_vmem)))

    out = pl.pallas_call(
        functools.partial(_routing_kernel, K=K, d=d, TN=TN, TS=TS, n_src=n_src,
                          iterations=iterations, inv_tau=1.0 / tau,
                          compute_dtype=compute_dtype),
        out_shape=jax.ShapeDtypeStruct((N_pad, F_out), jnp.float32),
        grid=(n_tiles,),
        in_specs=[
            # Whole hn slab, constant block index -> single DMA, VMEM-resident.
            pl.BlockSpec((N_pad, F_out), lambda i: (0, 0)),
            # int8 adjacency row tile of this dst node tile (pipelined).
            pl.BlockSpec((TN, N_pad), lambda i: (i, 0)),
        ],
        out_specs=pl.BlockSpec((TN, F_out), lambda i: (i, 0)),
        scratch_shapes=[pltpu.VMEM((n_src, TN, TS), jnp.float32)],
        compiler_params=pltpu.CompilerParams(
            dimension_semantics=("parallel",),
            vmem_limit_bytes=vmem_limit),
    )(hn, adj_i8)
    return out[:N]


# ----------------------------------------------------------------------------
# Pure-JAX reference with the torch edge-based semantics (validation only)
# ----------------------------------------------------------------------------
def disengcn_reference(x, weight, bias, edge_index, *, K, iterations, tau, N):
    F_out = weight.shape[1]
    d = F_out // K
    h = jnp.dot(x, weight, precision=jax.lax.Precision.HIGHEST) + bias
    h = jnp.where(h >= 0, h, NEG_SLOPE * h)
    h = h.reshape(N, K, d).transpose(1, 0, 2)                   # (K, N, d)
    h_normed = h / jnp.sqrt(jnp.sum(h ** 2, -1, keepdims=True))
    h_src = h_normed.transpose(1, 0, 2)                         # (N, K, d)
    h_dst = h_src
    row, col = edge_index[0], edge_index[1]
    for _ in range(iterations):
        s = jnp.sum(h_dst[row] * h_src[col], -1) / tau          # (E, K)
        e = jnp.exp(s)
        denom = jax.ops.segment_sum(e, row, num_segments=N)     # (N, K)
        p = e / denom[row]
        msg = h_src[col] * p[:, :, None]                        # (E, K, d)
        agg = jax.ops.segment_sum(msg, row, num_segments=N)     # (N, K, d)
        node_attr = agg.transpose(1, 0, 2) + h_normed           # (K, N, d)
        node_attr = node_attr / jnp.sqrt(jnp.sum(node_attr ** 2, -1, keepdims=True))
        h_dst = node_attr.transpose(1, 0, 2)
    return h_dst.reshape(N, K * d)


if __name__ == "__main__":
    # Small deterministic problem, large enough to exercise the tiling
    # (2 node tiles of 128 rows, 4 factors, 3 routing iterations).
    N = 256
    IN_FEATS = 64
    OUT_FEATS = 64
    K = 4
    ITERATIONS = 3
    TAU = 1.0

    key = jax.random.PRNGKey(0)
    kx, kw = jax.random.split(key)

    x = jax.random.normal(kx, (N, IN_FEATS), dtype=jnp.float32)

    # Parameters: xavier_normal_(gain=1.414), zero bias — as in reset_parameters().
    gain = 1.414
    std = gain * (2.0 / (IN_FEATS + OUT_FEATS)) ** 0.5
    weight = std * jax.random.normal(kw, (IN_FEATS, OUT_FEATS), dtype=jnp.float32)
    bias = jnp.zeros((OUT_FEATS,), dtype=jnp.float32)

    # Deterministic graph: bidirectional ring + self-loops (all edges unique).
    idx = jnp.arange(N)
    row = jnp.concatenate([idx, idx, idx])                       # edge_index[0] (dst)
    col = jnp.concatenate([(idx + 1) % N, (idx - 1) % N, idx])   # edge_index[1] (src)
    edge_index = jnp.stack([row, col])

    # Dense adjacency mask fed to the kernel, stored as int8 (0/1).
    adj_i8 = jnp.zeros((N, N), dtype=jnp.int8).at[row, col].set(1)

    ref = disengcn_reference(x, weight, bias, edge_index,
                             K=K, iterations=ITERATIONS, tau=TAU, N=N)

    # 1) Full-f32 configuration: tight check against the edge-based reference.
    out_f32 = disengcn_forward(x, weight, bias, adj_i8,
                               K=K, iterations=ITERATIONS, tau=TAU,
                               compute_dtype=jnp.float32)
    out_f32 = jax.block_until_ready(out_f32)
    assert out_f32.shape == (N, OUT_FEATS)
    err_f32 = float(jnp.max(jnp.abs(out_f32 - ref)))
    assert err_f32 < 5e-3, f"f32 kernel mismatch vs reference, max abs err = {err_f32}"

    # 2) bf16 storage + bf16 MXU path (v6e/v7x performance default): looser check.
    out_bf16 = disengcn_forward(x, weight, bias, adj_i8,
                                K=K, iterations=ITERATIONS, tau=TAU,
                                compute_dtype=jnp.bfloat16)
    out_bf16 = jax.block_until_ready(out_bf16)
    assert out_bf16.shape == (N, OUT_FEATS)
    err_bf16 = float(jnp.max(jnp.abs(out_bf16 - ref)))
    assert err_bf16 < 6e-2, f"bf16 kernel mismatch vs reference, max abs err = {err_bf16}"

    print("KERNEL_OK")
</pallas_src>

<mosaic_0001>
module attributes {stable_mosaic.version = 11 : i64} {
  func.func @_project_norm_kernel(%arg0: i32, %arg1: memref<128x64xf32, #tpu.memory_space<vmem>>, %arg2: memref<64x64xf32, #tpu.memory_space<vmem>>, %arg3: memref<1x64xf32, #tpu.memory_space<vmem>>, %arg4: memref<64x64xf32, #tpu.memory_space<vmem>>, %arg5: memref<128x64xf32, #tpu.memory_space<vmem>>) attributes {dimension_semantics = [#tpu.dimension_semantics<parallel>], iteration_bounds = array<i64: 2>, scalar_prefetch = 0 : i64, scratch_operands = 0 : i64, tpu.core_type = #tpu.core_type<tc>, window_params = [{transform_indices = @transform_0, window_bounds = array<i64: 128, 64>}, {pipeline_mode = #tpu.pipeline_mode<synchronous>, transform_indices = @transform_1, window_bounds = array<i64: 64, 64>}, {pipeline_mode = #tpu.pipeline_mode<synchronous>, transform_indices = @transform_2, window_bounds = array<i64: 1, 64>}, {pipeline_mode = #tpu.pipeline_mode<synchronous>, transform_indices = @transform_3, window_bounds = array<i64: 64, 64>}, {transform_indices = @transform_4, window_bounds = array<i64: 128, 64>}]} {
    %c0 = arith.constant 0 : index
    %c0_0 = arith.constant 0 : index
    %0 = vector.load %arg1[%c0, %c0_0] : memref<128x64xf32, #tpu.memory_space<vmem>>, vector<128x64xf32>
    %c0_1 = arith.constant 0 : index
    %c0_2 = arith.constant 0 : index
    %1 = vector.load %arg2[%c0_1, %c0_2] : memref<64x64xf32, #tpu.memory_space<vmem>>, vector<64x64xf32>
    %cst = arith.constant dense<0.000000e+00> : vector<128x64xf32>
    %2 = tpu.matmul %0, %1, %cst {dimension_numbers = #tpu.dot_dimension_numbers<[1], [0], [0], [1], [0, 0, 1, 1], [], []>} : vector<128x64xf32>, vector<64x64xf32>, vector<128x64xf32> -> vector<128x64xf32>
    %c0_3 = arith.constant 0 : index
    %c0_4 = arith.constant 0 : index
    %3 = vector.load %arg3[%c0_3, %c0_4] : memref<1x64xf32, #tpu.memory_space<vmem>>, vector<1x64xf32>
    %4 = vector.broadcast %3 : vector<1x64xf32> to vector<128x64xf32>
    %5 = arith.addf %2, %4 : vector<128x64xf32>
    %cst_5 = arith.constant 0.000000e+00 : f32
    %6 = vector.broadcast %cst_5 : f32 to vector<128x64xf32>
    %7 = arith.cmpf oge, %5, %6 : vector<128x64xf32>
    %cst_6 = arith.constant 0.00999999977 : f32
    %8 = vector.broadcast %cst_6 : f32 to vector<128x64xf32>
    %9 = arith.mulf %8, %5 : vector<128x64xf32>
    %10 = arith.select %7, %5, %9 : vector<128x64xi1>, vector<128x64xf32>
    %11 = arith.mulf %10, %10 : vector<128x64xf32>
    %c0_7 = arith.constant 0 : index
    %c0_8 = arith.constant 0 : index
    %12 = vector.load %arg4[%c0_7, %c0_8] : memref<64x64xf32, #tpu.memory_space<vmem>>, vector<64x64xf32>
    %cst_9 = arith.constant dense<0.000000e+00> : vector<128x64xf32>
    %13 = tpu.matmul %11, %12, %cst_9 {dimension_numbers = #tpu.dot_dimension_numbers<[1], [0], [0], [1], [0, 0, 1, 1], [], []>} : vector<128x64xf32>, vector<64x64xf32>, vector<128x64xf32> -> vector<128x64xf32>
    %cst_10 = arith.constant 1.000000e-30 : f32
    %14 = vector.broadcast %cst_10 : f32 to vector<128x64xf32>
    %15 = arith.maximumf %13, %14 : vector<128x64xf32>
    %16 = math.rsqrt %15 : vector<128x64xf32>
    %17 = arith.mulf %10, %16 : vector<128x64xf32>
    %c0_11 = arith.constant 0 : index
    %c0_12 = arith.constant 0 : index
    %18 = vector.load %arg5[%c0_11, %c0_12] : memref<128x64xf32, #tpu.memory_space<vmem>>, vector<128x64xf32>
    tpu.vector_store %arg5[%c0_11, %c0_12], %17 {strides = array<i32>} : memref<128x64xf32, #tpu.memory_space<vmem>>, vector<128x64xf32>,
    return
  }
  func.func @transform_0(%arg0: i32) -> (i32, i32) {
    %c0_i32 = arith.constant 0 : i32
    %c0_i32_0 = arith.constant 0 : i32
    return %arg0, %c0_i32 : i32, i32
  }
  func.func @transform_1(%arg0: i32) -> (i32, i32) {
    %c0_i32 = arith.constant 0 : i32
    %c0_i32_0 = arith.constant 0 : i32
    %c0_i32_1 = arith.constant 0 : i32
    return %c0_i32, %c0_i32_0 : i32, i32
  }
  func.func @transform_2(%arg0: i32) -> (i32, i32) {
    %c0_i32 = arith.constant 0 : i32
    %c0_i32_0 = arith.constant 0 : i32
    %c0_i32_1 = arith.constant 0 : i32
    return %c0_i32, %c0_i32_0 : i32, i32
  }
  func.func @transform_3(%arg0: i32) -> (i32, i32) {
    %c0_i32 = arith.constant 0 : i32
    %c0_i32_0 = arith.constant 0 : i32
    %c0_i32_1 = arith.constant 0 : i32
    return %c0_i32, %c0_i32_0 : i32, i32
  }
  func.func @transform_4(%arg0: i32) -> (i32, i32) {
    %c0_i32 = arith.constant 0 : i32
    %c0_i32_0 = arith.constant 0 : i32
    return %arg0, %c0_i32 : i32, i32
  }
}

</mosaic_0001>

<bundles_post_ra>
// kernel: tpu_custom_call.1
= control target key start
LH: loop header
LB: loop body
LE: loop exit
PB: predicated region body
PF: predicated region fallthrough
CT: control target
= control target key end

     0   :  { %s1088_s15 = smov 0   ;;  %s1345_s0 = inlined_call_operand.vmem [shape: f32[256,64], index: 0, kind: input, shape index: {}]   ;;  %s1346_s1 = inlined_call_operand.vmem [shape: f32[64,64], index: 1, kind: input, shape index: {}]   ;;  %s1347_s2 = inlined_call_operand.vmem [shape: f32[1,64], index: 2, kind: input, shape index: {}]   ;;  %s1348_s3 = inlined_call_operand.vmem [shape: f32[64,64], index: 3, kind: input, shape index: {}]   ;;  %s1349_s4 = inlined_call_operand.vmem [shape: f32[256,64], index: 4, kind: output, shape index: {}]  }
   0x1 LB: > { %s811_s16 = sadd.s32 4294967295, %s1061_s15   ;;  %p815_p0 = scmp.ge.s32.totalorder %s1061_s15, 1  ;;  %s1061_s15 = sphi %s1088_s15, %s14_s15  }
   0x2   : > { %p163_p1 = scmp.lt.s32.totalorder %s1061_s15, 3 }
   0x4   : > { %p164_p2 = pnand %p815_p0, %p163_p1 }
   0x5   : > { %v217_v0 = vld [vmem:[%s1346_s1] sm:$0xff] (!%p164_p2)  ;;  %v218_v1 = vld [vmem:[%s1346_s1 + $0x8] sm:$0xff] (!%p164_p2)  ;;  %v219_v2 = vld [vmem:[%s1346_s1 + $0x10] sm:$0xff] (!%p164_p2)  ;;  %s816_s23 = sshll.u32 (!%p164_p2), %s811_s16, 4  ;;  %vm232_vm0 = vcmask (!%p164_p2), 523264  }
   0x6   : > { %167 = sbr.rel (%p164_p2) target bundleno = 502 (0x1f6), region = 36  ;;  %v983_v3 = vpack.c.bf16 (!%p164_p2), %v218_v1, %v217_v0  ;;  %v220_v4 = vld [vmem:[%s1346_s1 + $0x18] sm:$0xff] (!%p164_p2)  ;;  %p190_p3 = scmp.lt.s32.totalorder (!%p164_p2), %s816_s23, 31  ;;  %v221_v6 = vld [vmem:[%s1346_s1 + $0x20] sm:$0xff] (!%p164_p2)  ;;  %v222_v7 = vld [vmem:[%s1346_s1 + $0x28] sm:$0xff] (!%p164_p2) }
   0x7   : > { %v987_v5 = vpack.c.bf16 (!%p164_p2), %v220_v4, %v219_v2  ;;  %v490_v8 = vld [vmem:[%s1348_s3] sm:$0xff] (!%p164_p2)  ;;  %v491_v9 = vld [vmem:[%s1348_s3 + $0x8] sm:$0xff] (!%p164_p2)  ;;  %v492_v10 = vld [vmem:[%s1348_s3 + $0x10] sm:$0xff] (!%p164_p2)  ;;  %v991_v13 = vpack.c.bf16 (!%p164_p2), %v222_v7, %v221_v6 }
   0x8   : > { %984 = vmatprep.subr.bf16.mxu0 (!%p164_p2), %v983_v3  ;;  %v493_v11 = vld [vmem:[%s1348_s3 + $0x18] sm:$0xff] (!%p164_p2)  ;;  %v999_v12 = vpack.c.bf16 (!%p164_p2), %v491_v9, %v490_v8  ;;  %v223_v15 = vld [vmem:[%s1346_s1 + $0x30] sm:$0xff] (!%p164_p2)  ;;  %v494_v34 = vld [vmem:[%s1348_s3 + $0x20] sm:$0xff] (!%p164_p2) }
   0x9   : > { %986 = vmatpush3.bf16.msra.mxu0 (!%p164_p2), %v983_v3  ;;  %v1003_v14 = vpack.c.bf16 (!%p164_p2), %v493_v11, %v492_v10  ;;  %v224_v16 = vld [vmem:[%s1346_s1 + $0x38] sm:$0xff] (!%p164_p2)  ;;  %v495_v35 = vld [vmem:[%s1348_s3 + $0x28] sm:$0xff] (!%p164_p2)  ;;  %v496_v37 = vld [vmem:[%s1348_s3 + $0x30] sm:$0xff] (!%p164_p2) }
   0xa   : > { %988 = vmatprep.subr.bf16.mxu0 (!%p164_p2), %v987_v5  ;;  %1000 = vmatprep.subr.bf16.mxu1 (!%p164_p2), %v999_v12  ;;  %v995_v18 = vpack.c.bf16 (!%p164_p2), %v224_v16, %v223_v15  ;;  %v1007_v36 = vpack.c.bf16 (!%p164_p2), %v495_v35, %v494_v34  ;;  %v497_v38 = vld [vmem:[%s1348_s3 + $0x38] sm:$0xff] (!%p164_p2)  ;;  %v1189_v40 = vld [vmem:[%s1347_s2] ss:$0 sm:$0xff] (!%p164_p2) }
   0xb   : > { %1002 = vmatpush3.bf16.msra.mxu1 (!%p164_p2), %v999_v12  ;;  %v1011_v39 = vpack.c.bf16 (!%p164_p2), %v497_v38, %v496_v37 }
   0xc   : > { %1004 = vmatprep.subr.bf16.mxu1 (!%p164_p2), %v1003_v14 }
   0xd   : > { %s1351_s23 = smov (!%p190_p3, %s816_s23), 31  ;;  %990 = vmatpush3.bf16.msra.mxu0 %v987_v5 }
   0xe   : > { %s817_s12 = sshll.u32 %s1351_s23, 3  ;;  %992 = vmatprep.subr.bf16.mxu0 %v991_v13 }
   0xf   : > { %s1140_s20 = scalar_lea.vmem %s1345_s0, %s817_s12  ;;  %1006 = vmatpush3.bf16.msra.mxu1 %v1003_v14  ;;  %s1292_s8 = scalar_lea.vmem %s1349_s4, %s817_s12 }
  0x10   : > { %v201_v17 = vld [vmem:[%s1140_s20] sm:$0xff]  ;;  %v202_v19 = vld [vmem:[%s1140_s20 + $0x8] sm:$0xff]  ;;  %v203_v20 = vld [vmem:[%s1140_s20 + $0x10] sm:$0xff]  ;;  %1008 = vmatprep.subr.bf16.mxu1 %v1007_v36 }
  0x11   : > { %919 = vmatprep.mubr.msk.f32.mxu0 %vm232_vm0, %v201_v17  ;;  %994 = vmatpush3.bf16.msra.mxu0 %v991_v13  ;;  %v204_v21 = vld [vmem:[%s1140_s20 + $0x18] sm:$0xff]  ;;  %v205_v22 = vld [vmem:[%s1140_s20 + $0x20] sm:$0xff]  ;;  %v206_v23 = vld [vmem:[%s1140_s20 + $0x28] sm:$0xff] }
  0x12   : > { %996 = vmatprep.subr.bf16.mxu0 %v995_v18  ;;  %v207_v24 = vld [vmem:[%s1140_s20 + $0x30] sm:$0xff]  ;;  %v208_v25 = vld [vmem:[%s1140_s20 + $0x38] sm:$0xff]  ;;  %v209_v26 = vld [vmem:[%s1140_s20 + $0x40] sm:$0xff] }
  0x13   : > { %v210_v27 = vld [vmem:[%s1140_s20 + $0x48] sm:$0xff]  ;;  %v211_v28 = vld [vmem:[%s1140_s20 + $0x50] sm:$0xff]  ;;  %v212_v29 = vld [vmem:[%s1140_s20 + $0x58] sm:$0xff]  ;;  %1010 = vmatpush3.bf16.msra.mxu1 %v1007_v36 }
  0x14   : > { %v213_v30 = vld [vmem:[%s1140_s20 + $0x60] sm:$0xff]  ;;  %v214_v31 = vld [vmem:[%s1140_s20 + $0x68] sm:$0xff]  ;;  %v215_v32 = vld [vmem:[%s1140_s20 + $0x70] sm:$0xff]  ;;  %1012 = vmatprep.subr.bf16.mxu1 %v1011_v39 }
  0x15   : > { %998 = vmatpush3.bf16.msra.mxu0 %v995_v18  ;;  %v216_v33 = vld [vmem:[%s1140_s20 + $0x78] sm:$0xff] }
  0x17   : > { %1014 = vmatpush3.bf16.msra.mxu1 %v1011_v39 }
  0x18   : > { %920 = vmatmul.mubr.msk.f32.vlgmr.msra.gmra.mrb[0].mxu0 %vm232_vm0, %v202_v19 }
  0x19   : > { %922 = vmatprep.mubr.msk.f32.mxu0 %vm232_vm0, %v203_v20 }
  0x1c   : > { %923 = vmatmul.mubr.msk.f32.gmra.mrb[2].mxu0 %vm232_vm0, %v204_v21 }
  0x1d   : > { %925 = vmatprep.mubr.msk.f32.mxu0 %vm232_vm0, %v205_v22 }
  0x20   : > { %926 = vmatmul.mubr.msk.f32.gmra.mrb[4].mxu0 %vm232_vm0, %v206_v23 }
  0x21   : > { %928 = vmatprep.mubr.msk.f32.mxu0 %vm232_vm0, %v207_v24 }
  0x24   : > { %929 = vmatmul.mubr.msk.f32.gmra.mrb[6].mxu0 %vm232_vm0, %v208_v25 }
  0x25   : > { %931 = vmatprep.mubr.msk.f32.mxu0 %vm232_vm0, %v209_v26 }
  0x28   : > { %932 = vmatmul.mubr.msk.f32.gmra.mrb[8].mxu0 %vm232_vm0, %v210_v27 }
  0x29   : > { %934 = vmatprep.mubr.msk.f32.mxu0 %vm232_vm0, %v211_v28 }
  0x2c   : > { %935 = vmatmul.mubr.msk.f32.gmra.mrb[10].mxu0 %vm232_vm0, %v212_v29 }
  0x2d   : > { %937 = vmatprep.mubr.msk.f32.mxu0 %vm232_vm0, %v213_v30 }
  0x30   : > { %938 = vmatmul.mubr.msk.f32.gmra.mrb[12].mxu0 %vm232_vm0, %v214_v31 }
  0x31   : > { %940 = vmatprep.mubr.msk.f32.mxu0 %vm232_vm0, %v215_v32 }
  0x34   : > { %941 = vmatmul.mubr.msk.f32.gmra.mrb[14].mxu0 %vm232_vm0, %v216_v33 }
  0xeb   : > { %v921_v41 = vpop.f32.mrb[0].mxu0 }
  0xec   : > { %v353_v42 = vadd.f32 %v921_v41, %v1189_v40  ;;  %v347_v43 = vpop.f32.mrb[1].mxu0 }
  0xed   : > { %v348_v44 = vadd.f32 %v1189_v40, %v347_v43 }
  0xee   : > { %vm427_vm1 = vcmp.ge.f32.partialorder %v353_v42, 0.0  ;;  %v443_v45 = vmul.f32 0.01, %v353_v42 }
  0xef   : > { %v442_v46 = vmul.f32 0.01, %v348_v44  ;;  %v924_v47 = vpop.f32.mrb[2].mxu0  ;;  %vm426_vm2 = vcmp.ge.f32.partialorder %v348_v44, 0.0 }
  0xf0   : > { %v1193_v48 = vsel %vm427_vm1, %v353_v42, %v443_v45  ;;  %v363_v49 = vadd.f32 %v924_v47, %v1189_v40  ;;  %v357_v50 = vpop.f32.mrb[3].mxu0 }
  0xf1   : > { %v358_v51 = vadd.f32 %v1189_v40, %v357_v50  ;;  %v1197_v52 = vsel %vm426_vm2, %v348_v44, %v442_v46  ;;  %v475_v55 = vmul.f32 %v1193_v48, %v1193_v48 }
  0xf2   : > { %vm429_vm3 = vcmp.ge.f32.partialorder %v363_v49, 0.0  ;;  %v445_v53 = vmul.f32 0.01, %v363_v49  ;;  %v474_v54 = vmul.f32 %v1197_v52, %v1197_v52 }
  0xf3   : > { %vm428_vm4 = vcmp.ge.f32.partialorder %v358_v51, 0.0  ;;  %v444_v56 = vmul.f32 0.01, %v358_v51  ;;  %v927_v57 = vpop.f32.mrb[4].mxu0 }
  0xf4   : > { %v1203_v58 = vsel %vm429_vm3, %v363_v49, %v445_v53  ;;  %v373_v59 = vadd.f32 %v927_v57, %v1189_v40  ;;  %v367_v60 = vpop.f32.mrb[5].mxu0  ;;  %959 = vmatprep.mubr.msk.f32.mxu1 %vm232_vm0, %v474_v54 }
  0xf5   : > { %v1207_v61 = vsel %vm428_vm4, %v358_v51, %v444_v56  ;;  %v368_v62 = vadd.f32 %v1189_v40, %v367_v60  ;;  %960 = vmatmul.mubr.msk.f32.vlgmr.msra.gmra.mrb[0].mxu1 %vm232_vm0, %v475_v55  ;;  %v477_v1 = vmul.f32 %v1203_v58, %v1203_v58 }
  0xf6   : > { %v476_v63 = vmul.f32 %v1207_v61, %v1207_v61  ;;  %vm431_vm5 = vcmp.ge.f32.partialorder %v373_v59, 0.0  ;;  %v447_v0 = vmul.f32 0.01, %v373_v59 }
  0xf7   : > { %vm430_vm6 = vcmp.ge.f32.partialorder %v368_v62, 0.0  ;;  %v446_v2 = vmul.f32 0.01, %v368_v62  ;;  %v930_v3 = vpop.f32.mrb[6].mxu0 }
  0xf8   : > { %v1215_v4 = vsel %vm431_vm5, %v373_v59, %v447_v0  ;;  %v383_v5 = vadd.f32 %v930_v3, %v1189_v40  ;;  %v377_v6 = vpop.f32.mrb[7].mxu0  ;;  %962 = vmatprep.mubr.msk.f32.mxu1 %vm232_vm0, %v476_v63 }
  0xf9   : > { %v1219_v7 = vsel %vm430_vm6, %v368_v62, %v446_v2  ;;  %v378_v8 = vadd.f32 %v1189_v40, %v377_v6  ;;  %963 = vmatmul.mubr.msk.f32.gmra.mrb[2].mxu1 %vm232_vm0, %v477_v1  ;;  %v479_v11 = vmul.f32 %v1215_v4, %v1215_v4 }
  0xfa   : > { %v478_v9 = vmul.f32 %v1219_v7, %v1219_v7  ;;  %vm433_vm7 = vcmp.ge.f32.partialorder %v383_v5, 0.0  ;;  %v449_v10 = vmul.f32 0.01, %v383_v5 }
  0xfb   : > { %vm432_vm8 = vcmp.ge.f32.partialorder %v378_v8, 0.0  ;;  %v448_v12 = vmul.f32 0.01, %v378_v8  ;;  %v933_v13 = vpop.f32.mrb[8].mxu0 }
  0xfc   : > { %v1227_v14 = vsel %vm433_vm7, %v383_v5, %v449_v10  ;;  %v393_v15 = vadd.f32 %v933_v13, %v1189_v40  ;;  %v387_v16 = vpop.f32.mrb[9].mxu0  ;;  %965 = vmatprep.mubr.msk.f32.mxu1 %vm232_vm0, %v478_v9 }
  0xfd   : > { %v1231_v17 = vsel %vm432_vm8, %v378_v8, %v448_v12  ;;  %v388_v18 = vadd.f32 %v1189_v40, %v387_v16  ;;  %966 = vmatmul.mubr.msk.f32.gmra.mrb[4].mxu1 %vm232_vm0, %v479_v11  ;;  %v481_v21 = vmul.f32 %v1227_v14, %v1227_v14 }
  0xfe   : > { %v480_v19 = vmul.f32 %v1231_v17, %v1231_v17  ;;  %vm435_vm9 = vcmp.ge.f32.partialorder %v393_v15, 0.0  ;;  %v451_v20 = vmul.f32 0.01, %v393_v15 }
  0xff   : > { %vm434_vm10 = vcmp.ge.f32.partialorder %v388_v18, 0.0  ;;  %v450_v22 = vmul.f32 0.01, %v388_v18  ;;  %v936_v23 = vpop.f32.mrb[10].mxu0 }
 0x100   : > { %v1239_v24 = vsel %vm435_vm9, %v393_v15, %v451_v20  ;;  %v403_v25 = vadd.f32 %v936_v23, %v1189_v40  ;;  %v397_v26 = vpop.f32.mrb[11].mxu0  ;;  %968 = vmatprep.mubr.msk.f32.mxu1 %vm232_vm0, %v480_v19 }
 0x101   : > { %v1243_v27 = vsel %vm434_vm10, %v388_v18, %v450_v22  ;;  %v398_v28 = vadd.f32 %v1189_v40, %v397_v26  ;;  %969 = vmatmul.mubr.msk.f32.gmra.mrb[6].mxu1 %vm232_vm0, %v481_v21  ;;  %v483_v31 = vmul.f32 %v1239_v24, %v1239_v24 }
 0x102   : > { %v482_v29 = vmul.f32 %v1243_v27, %v1243_v27  ;;  %vm437_vm11 = vcmp.ge.f32.partialorder %v403_v25, 0.0  ;;  %v453_v30 = vmul.f32 0.01, %v403_v25 }
 0x103   : > { %vm436_vm12 = vcmp.ge.f32.partialorder %v398_v28, 0.0  ;;  %v452_v32 = vmul.f32 0.01, %v398_v28  ;;  %v939_v33 = vpop.f32.mrb[12].mxu0 }
 0x104   : > { %v1251_v34 = vsel %vm437_vm11, %v403_v25, %v453_v30  ;;  %v413_v35 = vadd.f32 %v939_v33, %v1189_v40  ;;  %v407_v36 = vpop.f32.mrb[13].mxu0  ;;  %971 = vmatprep.mubr.msk.f32.mxu1 %vm232_vm0, %v482_v29 }
 0x105   : > { %v1255_v37 = vsel %vm436_vm12, %v398_v28, %v452_v32  ;;  %v408_v38 = vadd.f32 %v1189_v40, %v407_v36  ;;  %972 = vmatmul.mubr.msk.f32.gmra.mrb[8].mxu1 %vm232_vm0, %v483_v31  ;;  %v485_v42 = vmul.f32 %v1251_v34, %v1251_v34 }
 0x106   : > { %v484_v39 = vmul.f32 %v1255_v37, %v1255_v37  ;;  %vm439_vm13 = vcmp.ge.f32.partialorder %v413_v35, 0.0  ;;  %v455_v41 = vmul.f32 0.01, %v413_v35 }
 0x107   : > { %vm438_vm14 = vcmp.ge.f32.partialorder %v408_v38, 0.0  ;;  %v454_v43 = vmul.f32 0.01, %v408_v38  ;;  %v942_v44 = vpop.f32.mrb[14].mxu0 }
 0x108   : > { %v1263_v45 = vsel %vm439_vm13, %v413_v35, %v455_v41  ;;  %v423_v46 = vadd.f32 %v942_v44, %v1189_v40  ;;  %v417_v47 = vpop.f32.mrb[15].mxu0  ;;  %974 = vmatprep.mubr.msk.f32.mxu1 %vm232_vm0, %v484_v39 }
 0x109   : > { %v1267_v49 = vsel %vm438_vm14, %v408_v38, %v454_v43  ;;  %v418_v50 = vadd.f32 %v1189_v40, %v417_v47  ;;  %975 = vmatmul.mubr.msk.f32.gmra.mrb[10].mxu1 %vm232_vm0, %v485_v42  ;;  %v487_v54 = vmul.f32 %v1263_v45, %v1263_v45 }
 0x10a   : > { %v486_v51 = vmul.f32 %v1267_v49, %v1267_v49  ;;  %vm441_vm15 = vcmp.ge.f32.partialorder %v423_v46, 0.0  ;;  %v457_v53 = vmul.f32 0.01, %v423_v46 }
 0x10b   : > { %vm440_vm1 = vcmp.ge.f32.partialorder %v418_v50, 0.0  ;;  %v456_v55 = vmul.f32 0.01, %v418_v50 }
 0x10c   : > { %v1275_v56 = vsel %vm441_vm15, %v423_v46, %v457_v53  ;;  %977 = vmatprep.mubr.msk.f32.mxu1 %vm232_vm0, %v486_v51 }
 0x10d   : > { %v1278_v57 = vsel %vm440_vm1, %v418_v50, %v456_v55  ;;  %978 = vmatmul.mubr.msk.f32.gmra.mrb[12].mxu1 %vm232_vm0, %v487_v54  ;;  %v489_v59 = vmul.f32 %v1275_v56, %v1275_v56 }
 0x10e   : > { %v488_v40 = vmul.f32 %v1278_v57, %v1278_v57 }
 0x110   : > { %980 = vmatprep.mubr.msk.f32.mxu1 %vm232_vm0, %v488_v40 }
 0x111   : > { %981 = vmatmul.mubr.msk.f32.gmra.mrb[14].mxu1 %vm232_vm0, %v489_v59 }
 0x1c8   : > { %v961_v60 = vpop.f32.mrb[0].mxu1 }
 0x1c9   : > { %v692_v62 = vmax.f32 %v961_v60, 1e-30  ;;  %v612_v63 = vpop.f32.mrb[1].mxu1 }
 0x1ca   : > { %v691_v0 = vmax.f32 %v612_v63, 1e-30 }
 0x1cb   : > { %1023 = vrsqrt.f32 %v692_v62 }
 0x1cc   : > { %1025 = vrsqrt.f32 %v691_v0  ;;  %v964_v1 = vpop.f32.mrb[2].mxu1 }
 0x1cd   : > { %v694_v2 = vmax.f32 %v964_v1, 1e-30  ;;  %v622_v3 = vpop.f32.mrb[3].mxu1 }
 0x1ce   : > { %v693_v5 = vmax.f32 %v622_v3, 1e-30 }
 0x1cf   : > { %1027 = vrsqrt.f32 %v694_v2 }
 0x1d0   : > { %1029 = vrsqrt.f32 %v693_v5  ;;  %v967_v6 = vpop.f32.mrb[4].mxu1 }
 0x1d1   : > { %v696_v8 = vmax.f32 %v967_v6, 1e-30  ;;  %v632_v9 = vpop.f32.mrb[5].mxu1 }
 0x1d2   : > { %v695_v10 = vmax.f32 %v632_v9, 1e-30 }
 0x1d3   : > { %1031 = vrsqrt.f32 %v696_v8 }
 0x1d4   : > { %1033 = vrsqrt.f32 %v695_v10  ;;  %v970_v11 = vpop.f32.mrb[6].mxu1 }
 0x1d5   : > { %v1024_v12 = vpop.eup %1023  ;;  %v698_v13 = vmax.f32 %v970_v11, 1e-30  ;;  %v642_v15 = vpop.f32.mrb[7].mxu1 }
 0x1d6   : > { %v1026_v16 = vpop.eup %1025  ;;  %v724_v18 = vmul.f32 %v1024_v12, %v1193_v48  ;;  %v697_v19 = vmax.f32 %v642_v15, 1e-30 }
 0x1d7   : > { %v723_v20 = vmul.f32 %v1026_v16, %v1197_v52  ;;  %1035 = vrsqrt.f32 %v698_v13 }
 0x1d8   : > { %740 = vst.msk [vmem:[%s1292_s8 + $0x8] sm:$0xff] %vm232_vm0, %v724_v18  ;;  %1037 = vrsqrt.f32 %v697_v19  ;;  %v973_v21 = vpop.f32.mrb[8].mxu1 }
 0x1d9   : > { %v1028_v22 = vpop.eup %1027  ;;  %739 = vst.msk [vmem:[%s1292_s8] sm:$0xff] %vm232_vm0, %v723_v20  ;;  %v700_v23 = vmax.f32 %v973_v21, 1e-30  ;;  %v652_v25 = vpop.f32.mrb[9].mxu1 }
 0x1da   : > { %v1030_v26 = vpop.eup %1029  ;;  %v726_v28 = vmul.f32 %v1028_v22, %v1203_v58  ;;  %v699_v48 = vmax.f32 %v652_v25, 1e-30 }
 0x1db   : > { %v725_v29 = vmul.f32 %v1030_v26, %v1207_v61  ;;  %1039 = vrsqrt.f32 %v700_v23 }
 0x1dc   : > { %742 = vst.msk [vmem:[%s1292_s8 + $0x18] sm:$0xff] %vm232_vm0, %v726_v28  ;;  %1041 = vrsqrt.f32 %v699_v48  ;;  %v976_v52 = vpop.f32.mrb[10].mxu1 }
 0x1dd   : > { %v1032_v30 = vpop.eup %1031  ;;  %741 = vst.msk [vmem:[%s1292_s8 + $0x10] sm:$0xff] %vm232_vm0, %v725_v29  ;;  %v702_v31 = vmax.f32 %v976_v52, 1e-30  ;;  %v662_v32 = vpop.f32.mrb[11].mxu1 }
 0x1de   : > { %v1034_v33 = vpop.eup %1033  ;;  %v728_v35 = vmul.f32 %v1032_v30, %v1215_v4  ;;  %v701_v58 = vmax.f32 %v662_v32, 1e-30 }
 0x1df   : > { %v727_v36 = vmul.f32 %v1034_v33, %v1219_v7  ;;  %1043 = vrsqrt.f32 %v702_v31 }
 0x1e0   : > { %744 = vst.msk [vmem:[%s1292_s8 + $0x28] sm:$0xff] %vm232_vm0, %v728_v35  ;;  %1045 = vrsqrt.f32 %v701_v58  ;;  %v979_v61 = vpop.f32.mrb[12].mxu1 }
 0x1e1   : > { %v1036_v38 = vpop.eup %1035  ;;  %743 = vst.msk [vmem:[%s1292_s8 + $0x20] sm:$0xff] %vm232_vm0, %v727_v36  ;;  %v704_v39 = vmax.f32 %v979_v61, 1e-30  ;;  %v672_v41 = vpop.f32.mrb[13].mxu1 }
 0x1e2   : > { %v1038_v42 = vpop.eup %1037  ;;  %v730_v43 = vmul.f32 %v1036_v38, %v1227_v14  ;;  %v703_v4 = vmax.f32 %v672_v41, 1e-30 }
 0x1e3   : > { %v729_v44 = vmul.f32 %v1038_v42, %v1231_v17  ;;  %1047 = vrsqrt.f32 %v704_v39 }
 0x1e4   : > { %746 = vst.msk [vmem:[%s1292_s8 + $0x38] sm:$0xff] %vm232_vm0, %v730_v43  ;;  %1049 = vrsqrt.f32 %v703_v4  ;;  %v982_v7 = vpop.f32.mrb[14].mxu1 }
 0x1e5   : > { %v1040_v46 = vpop.eup %1039  ;;  %745 = vst.msk [vmem:[%s1292_s8 + $0x30] sm:$0xff] %vm232_vm0, %v729_v44  ;;  %v706_v47 = vmax.f32 %v982_v7, 1e-30  ;;  %v682_v50 = vpop.f32.mrb[15].mxu1 }
 0x1e6   : > { %v1042_v51 = vpop.eup %1041  ;;  %v732_v14 = vmul.f32 %v1040_v46, %v1239_v24  ;;  %v705_v53 = vmax.f32 %v682_v50, 1e-30 }
 0x1e7   : > { %v731_v17 = vmul.f32 %v1042_v51, %v1243_v27  ;;  %1051 = vrsqrt.f32 %v706_v47 }
 0x1e8   : > { %748 = vst.msk [vmem:[%s1292_s8 + $0x48] sm:$0xff] %vm232_vm0, %v732_v14  ;;  %1053 = vrsqrt.f32 %v705_v53 }
 0x1e9   : > { %v1044_v54 = vpop.eup %1043  ;;  %747 = vst.msk [vmem:[%s1292_s8 + $0x40] sm:$0xff] %vm232_vm0, %v731_v17 }
 0x1ea   : > { %v1046_v55 = vpop.eup %1045  ;;  %v734_v40 = vmul.f32 %v1044_v54, %v1251_v34 }
 0x1eb   : > { %v733_v59 = vmul.f32 %v1046_v55, %v1255_v37 }
 0x1ec   : > { %750 = vst.msk [vmem:[%s1292_s8 + $0x58] sm:$0xff] %vm232_vm0, %v734_v40 }
 0x1ed   : > { %v1048_v24 = vpop.eup %1047  ;;  %749 = vst.msk [vmem:[%s1292_s8 + $0x50] sm:$0xff] %vm232_vm0, %v733_v59 }
 0x1ee   : > { %v1050_v27 = vpop.eup %1049  ;;  %v736_v60 = vmul.f32 %v1048_v24, %v1263_v45 }
 0x1ef   : > { %v735_v62 = vmul.f32 %v1050_v27, %v1267_v49 }
 0x1f0   : > { %752 = vst.msk [vmem:[%s1292_s8 + $0x68] sm:$0xff] %vm232_vm0, %v736_v60 }
 0x1f1   : > { %v1052_v63 = vpop.eup %1051  ;;  %751 = vst.msk [vmem:[%s1292_s8 + $0x60] sm:$0xff] %vm232_vm0, %v735_v62 }
 0x1f2   : > { %v1054_v0 = vpop.eup %1053  ;;  %v738_v34 = vmul.f32 %v1052_v63, %v1275_v56 }
 0x1f3   : > { %v737_v37 = vmul.f32 %v1054_v0, %v1278_v57 }
 0x1f4   : > { %754 = vst.msk [vmem:[%s1292_s8 + $0x78] sm:$0xff] %vm232_vm0, %v738_v34 }
 0x1f5   : > { %753 = vst.msk [vmem:[%s1292_s8 + $0x70] sm:$0xff] %vm232_vm0, %v737_v37 }
 0x1f6 PF: > { %s14_s15 = sadd.s32 1, %s1061_s15  }
 0x1f7   : > { %p11_p4 = scmp.ge.s32.totalorder %s14_s15, 4  }
 0x1f9   :  { %13 = sbr.rel (!%p11_p4) target bundleno = 1 (0x1), region = 66 }

</bundles_post_ra>
